<compile_context>
chip_gen: v7x
topology: tpu7x:2x2x1
jax: 0.10.0
libtpu: 0.0.40
codegen_flags: <defaults>
</compile_context>

<pallas_src>
import functools

import jax
import jax.numpy as jnp
from jax.experimental import pallas as pl
from jax.experimental.pallas import tpu as pltpu


# ------------------------------ hardware budget -------------------------------


def _vmem_capacity_bytes():
    """Physical VMEM per core; conservative (v7x) fallback if query fails."""
    try:
        info = pltpu.get_tpu_info()
        cap = getattr(info, "vmem_capacity_bytes", None)
        if cap is not None and int(cap) >= (32 << 20):
            return int(cap)
    except Exception:
        pass
    return 64 << 20  # v7x per-TensorCore VMEM (smallest of v5e/v6e/v7x)


def _vmem_limit(need_bytes, cap):
    return int(min(max(need_bytes + (8 << 20), 32 << 20), int(cap * 0.9)))


def _round_up(x, m):
    return (x + m - 1) // m * m


def _divisor_multiple(n, m, cap):
    """Largest multiple of m dividing n and <= cap (None if none)."""
    best = None
    d = m
    top = min(n, cap)
    while d <= top:
        if n % d == 0:
            best = d
        d += m
    return best


def _pick_channel_tile(C, cap_channels):
    """Largest multiple-of-8 divisor of C that is <= cap_channels, else C."""
    cands = [d for d in range(8, C + 1, 8) if C % d == 0 and d <= cap_channels]
    return max(cands) if cands else C


# ------------------------------- fused kernel ---------------------------------


def _fused_kernel(x_ref, ph_ref, pw_ref, eh_ref, ew_ref,
                  w1_ref, wh_ref, ww_ref, o_ref):
    # x_ref: (1, C, HW)   ph_ref: (HW, H)  pw_ref: (HW, W)
    # eh_ref: (H, HW)     ew_ref: (W, HW)
    # w1_ref: (Cr, C)     wh_ref/ww_ref: (C, Cr)       o_ref: (1, C, HW)
    f32 = jnp.float32
    xb = x_ref[0]                                                  # (C, HW)

    # Average pools over W and over H as lane-dense MXU matmuls
    # (Ph/Pw already carry the 1/W and 1/H scaling).
    pooled_h = jnp.dot(xb, ph_ref[...], preferred_element_type=f32)  # (C, H)
    pooled_w = jnp.dot(xb, pw_ref[...], preferred_element_type=f32)  # (C, W)

    # 1x1 conv on the concatenated pools == conv applied to each half.
    z_h = jnp.maximum(
        jnp.dot(w1_ref[...], pooled_h, preferred_element_type=f32), 0.0)
    z_w = jnp.maximum(
        jnp.dot(w1_ref[...], pooled_w, preferred_element_type=f32), 0.0)
    s_h = jax.nn.sigmoid(
        jnp.dot(wh_ref[...], z_h, preferred_element_type=f32))      # (C, H)
    s_w = jax.nn.sigmoid(
        jnp.dot(ww_ref[...], z_w, preferred_element_type=f32))      # (C, W)

    # Rank-1 gate expanded onto the flattened lane-dense spatial axis.
    gate = (jnp.dot(s_h, eh_ref[...], preferred_element_type=f32) *
            jnp.dot(s_w, ew_ref[...], preferred_element_type=f32))  # (C, HW)
    o_ref[0] = (xb * gate).astype(o_ref.dtype)


def _ca_fused(x_flat, w1, wh, ww, N, C, H, W, cap, need):
    HW = H * W
    Cr = w1.shape[0]
    f32 = jnp.float32

    hw = jnp.arange(HW)
    oh_h = (hw[:, None] // W == jnp.arange(H)[None, :]).astype(f32)  # (HW, H)
    oh_w = (hw[:, None] % W == jnp.arange(W)[None, :]).astype(f32)   # (HW, W)
    ph = oh_h * (1.0 / W)
    pw = oh_w * (1.0 / H)
    eh = oh_h.T                                                      # (H, HW)
    ew = oh_w.T                                                      # (W, HW)

    flops = int(N * (4 * C * HW * (H + W) + 4 * C * Cr * (H + W) + 2 * C * HW))
    bytes_acc = int(2 * N * C * HW * 4 + 4 * (H + W) * HW * 4
                    + 3 * C * Cr * 4)

    out_flat = pl.pallas_call(
        _fused_kernel,
        out_shape=jax.ShapeDtypeStruct((N, C, HW), x_flat.dtype),
        grid_spec=pltpu.PrefetchScalarGridSpec(
            num_scalar_prefetch=0,
            grid=(N,),
            in_specs=[
                pl.BlockSpec((1, C, HW), lambda n: (n, 0, 0)),
                pl.BlockSpec((HW, H), lambda n: (0, 0)),
                pl.BlockSpec((HW, W), lambda n: (0, 0)),
                pl.BlockSpec((H, HW), lambda n: (0, 0)),
                pl.BlockSpec((W, HW), lambda n: (0, 0)),
                pl.BlockSpec((Cr, C), lambda n: (0, 0)),
                pl.BlockSpec((C, Cr), lambda n: (0, 0)),
                pl.BlockSpec((C, Cr), lambda n: (0, 0)),
            ],
            out_specs=pl.BlockSpec((1, C, HW), lambda n: (n, 0, 0)),
        ),
        compiler_params=pltpu.CompilerParams(
            dimension_semantics=("parallel",),
            vmem_limit_bytes=_vmem_limit(need, cap)),
        cost_estimate=pl.CostEstimate(
            flops=flops,
            transcendentals=int(N * C * (H + W)),
            bytes_accessed=bytes_acc),
    )(x_flat, ph, pw, eh, ew, w1, wh, ww)

    return out_flat.reshape(N, C, H, W)


# --------------------- fallback pass 1: gate (streamed pools) -----------------


def _gate_kernel(x_ref, hid_ref, wid_ref, w1_ref, wh_ref, ww_ref, s_ref,
                 acc_h_ref, acc_w_ref):
    # x_ref: (1, C, Thw)  hid_ref/wid_ref: (Thw, 1) int32
    # w1_ref: (Cr, C)     wh_ref/ww_ref: (C, Cr)
    # s_ref: (1, C, H+W)  acc_h_ref: (C, H)  acc_w_ref: (C, W)
    s = pl.program_id(1)
    f32 = jnp.float32
    Thw = x_ref.shape[2]
    H = acc_h_ref.shape[1]
    W = acc_w_ref.shape[1]

    @pl.when(s == 0)
    def _():
        acc_h_ref[...] = jnp.zeros_like(acc_h_ref)
        acc_w_ref[...] = jnp.zeros_like(acc_w_ref)

    # Build the pooling one-hot tiles in-kernel (VPU filler, hidden under the
    # DMA-bound stream) instead of streaming a (HW, H+W) matrix from HBM.
    hi = hid_ref[...]                                             # (Thw, 1)
    wi = wid_ref[...]
    p_h = (hi == jax.lax.broadcasted_iota(jnp.int32, (Thw, H), 1)
           ).astype(f32) * (1.0 / W)                              # (Thw, H)
    p_w = (wi == jax.lax.broadcasted_iota(jnp.int32, (Thw, W), 1)
           ).astype(f32) * (1.0 / H)                              # (Thw, W)

    xb = x_ref[0]                                                 # (C, Thw)
    acc_h_ref[...] += jnp.dot(xb, p_h, preferred_element_type=f32)
    acc_w_ref[...] += jnp.dot(xb, p_w, preferred_element_type=f32)

    @pl.when(s == pl.num_programs(1) - 1)
    def _():
        z_h = jnp.maximum(
            jnp.dot(w1_ref[...], acc_h_ref[...],
                    preferred_element_type=f32), 0.0)             # (Cr, H)
        z_w = jnp.maximum(
            jnp.dot(w1_ref[...], acc_w_ref[...],
                    preferred_element_type=f32), 0.0)             # (Cr, W)
        s_h = jax.nn.sigmoid(
            jnp.dot(wh_ref[...], z_h, preferred_element_type=f32))
        s_w = jax.nn.sigmoid(
            jnp.dot(ww_ref[...], z_w, preferred_element_type=f32))
        # Single lane-packed gate output (H+W lanes).
        s_ref[0] = jnp.concatenate([s_h, s_w], axis=-1).astype(s_ref.dtype)


# ---------------------- fallback pass 2: rescale (streamed) -------------------


def _rescale_kernel(x_ref, s_ref, eh_ref, ew_ref, o_ref):
    # x_ref: (1, Tc, Thw2)  s_ref: (1, Tc, H+W)
    # eh_ref: (H, Thw2)     ew_ref: (W, Thw2)   o_ref: (1, Tc, Thw2)
    f32 = jnp.float32
    H = eh_ref.shape[0]
    sc = s_ref[0]                                                  # (Tc, H+W)
    sh = sc[:, :H]
    sw = sc[:, H:]
    gate = (jnp.dot(sh, eh_ref[...], preferred_element_type=f32) *
            jnp.dot(sw, ew_ref[...], preferred_element_type=f32))  # (Tc, Thw2)
    o_ref[0] = (x_ref[0] * gate).astype(o_ref.dtype)


def _ca_two_pass(x_flat, w1, wh, ww, N, C, H, W, cap):
    HW = H * W
    Cr = w1.shape[0]
    f32 = jnp.float32

    small_vmem = cap <= (80 << 20)                 # v7x-class budget
    blk_budget = (2 << 20) if small_vmem else (6 << 20)   # per x/out buffer
    exp_budget = (4 << 20) if small_vmem else (8 << 20)   # Eh+Ew incl. dbuf

    # Pad flattened spatial axis to a multiple of 128 lanes (unmasked tiles).
    HWp = _round_up(HW, 128)
    pad = HWp - HW
    if pad:
        x_flat = jnp.pad(x_flat, ((0, 0), (0, 0), (0, pad)))

    hw = jnp.arange(HWp)
    h_idx = jnp.where(hw < HW, hw // W, -1).astype(jnp.int32)
    w_idx = jnp.where(hw < HW, hw % W, -1).astype(jnp.int32)
    hid = h_idx.reshape(HWp, 1)
    wid = w_idx.reshape(HWp, 1)
    eh = (jnp.arange(H)[:, None] == h_idx[None, :]).astype(f32)   # (H, HWp)
    ew = (jnp.arange(W)[:, None] == w_idx[None, :]).astype(f32)   # (W, HWp)

    # ---------------- pass 1: lane-packed gates (N, C, H+W) -----------------
    lane_cap1 = min(2048, max(128, (blk_budget // (C * 4)) // 128 * 128))
    Thw = _divisor_multiple(HWp, 128, lane_cap1) or HWp
    S = HWp // Thw
    need1 = (2 * C * Thw * 4                       # x (double-buffered)
             + 2 * 2 * Thw * 128 * 4               # hid/wid (lane-padded)
             + 4 * C * (H + W) * 4                 # accs + packed out block
             + 2 * Thw * (H + W) * 4               # in-kernel one-hot tiles
             + 2 * 3 * C * Cr * 4
             + (4 << 20))

    s_cat = pl.pallas_call(
        _gate_kernel,
        out_shape=jax.ShapeDtypeStruct((N, C, H + W), f32),
        grid_spec=pltpu.PrefetchScalarGridSpec(
            num_scalar_prefetch=0,
            grid=(N, S),
            in_specs=[
                pl.BlockSpec((1, C, Thw), lambda n, s: (n, 0, s)),
                pl.BlockSpec((Thw, 1), lambda n, s: (s, 0)),
                pl.BlockSpec((Thw, 1), lambda n, s: (s, 0)),
                pl.BlockSpec((Cr, C), lambda n, s: (0, 0)),
                pl.BlockSpec((C, Cr), lambda n, s: (0, 0)),
                pl.BlockSpec((C, Cr), lambda n, s: (0, 0)),
            ],
            out_specs=pl.BlockSpec((1, C, H + W), lambda n, s: (n, 0, 0)),
            scratch_shapes=[pltpu.VMEM((C, H), jnp.float32),
                            pltpu.VMEM((C, W), jnp.float32)],
        ),
        compiler_params=pltpu.CompilerParams(
            dimension_semantics=("parallel", "arbitrary"),
            vmem_limit_bytes=_vmem_limit(need1, cap)),
        cost_estimate=pl.CostEstimate(
            flops=int(2 * N * C * HWp * (H + W)),
            transcendentals=int(N * C * (H + W)),
            bytes_accessed=int(N * C * HWp * 4 + N * C * (H + W) * 4)),
    )(x_flat, hid, wid, w1, wh, ww)

    # ---------------- pass 2: bandwidth-bound rescale -----------------------
    lane_cap2 = min(32768, max(128, (exp_budget // (16 * (H + W))) // 128 * 128))
    Thw2 = _divisor_multiple(HWp, 128, lane_cap2) or HWp
    S2 = HWp // Thw2
    tc_cap = max(8, (blk_budget // (Thw2 * 4)) // 8 * 8)
    Tc = _pick_channel_tile(C, tc_cap)
    need2 = (4 * Tc * Thw2 * 4                     # x + out (double-buffered)
             + 2 * Tc * (H + W) * 4                # gate blocks
             + 4 * (H + W) * Thw2 * 4              # Eh + Ew (double-buffered)
             + Tc * Thw2 * 4                       # gate temporary
             + (4 << 20))

    # TODO(synk): sweep pipeline_mode=pl.Buffered(3) on the x input here.
    out_flat = pl.pallas_call(
        _rescale_kernel,
        out_shape=jax.ShapeDtypeStruct((N, C, HWp), x_flat.dtype),
        grid_spec=pltpu.PrefetchScalarGridSpec(
            num_scalar_prefetch=0,
            # Spatial axis outermost so the Eh/Ew tiles are fetched once per
            # spatial tile, not once per (batch, channel-chunk) step.
            grid=(S2, N, C // Tc),
            in_specs=[
                pl.BlockSpec((1, Tc, Thw2), lambda s, n, c: (n, c, s)),
                pl.BlockSpec((1, Tc, H + W), lambda s, n, c: (n, c, 0)),
                pl.BlockSpec((H, Thw2), lambda s, n, c: (0, s)),
                pl.BlockSpec((W, Thw2), lambda s, n, c: (0, s)),
            ],
            out_specs=pl.BlockSpec((1, Tc, Thw2), lambda s, n, c: (n, c, s)),
        ),
        compiler_params=pltpu.CompilerParams(
            dimension_semantics=("arbitrary", "parallel", "parallel"),
            vmem_limit_bytes=_vmem_limit(need2, cap)),
        cost_estimate=pl.CostEstimate(
            flops=int(2 * N * C * HWp * (H + W) + 2 * N * C * HWp),
            transcendentals=0,
            bytes_accessed=int(2 * N * C * HWp * 4)),
    )(x_flat, s_cat, eh, ew)

    if pad:
        out_flat = out_flat[:, :, :HW]
    return out_flat.reshape(N, C, H, W)


# --------------------------------- wrapper ------------------------------------


def ca_block(x, w1, wh, ww, *, force_two_pass=False):
    N, C, H, W = x.shape
    HW = H * W
    Cr = w1.shape[0]
    cap = _vmem_capacity_bytes()

    x_flat = x.reshape(N, C, HW)      # free: lane-dense flattened spatial axis

    # Fused-path fit check (x block + out block + temporaries + constants,
    # all double-buffered) against a per-generation VMEM budget.
    xblk = C * HW * 4
    const_bytes = 2 * (H + W) * HW * 4           # (Ph,Pw) and (Eh,Ew) pairs
    fused_need = 6 * xblk + 2 * const_bytes + 2 * 3 * C * Cr * 4 + (4 << 20)

    if not force_two_pass and fused_need <= int(cap * 0.55):
        return _ca_fused(x_flat, w1, wh, ww, N, C, H, W, cap, fused_need)
    return _ca_two_pass(x_flat, w1, wh, ww, N, C, H, W, cap)


# ------------------------------- reference ------------------------------------


def ca_block_ref(x, w1, wh, ww):
    # Pure-JAX reference of the PyTorch forward (BN is never called there).
    pooled_h = jnp.mean(x, axis=3)                       # (N, C, H)
    pooled_w = jnp.mean(x, axis=2)                       # (N, C, W)
    z_h = jax.nn.relu(jnp.einsum("rc,nch->nrh", w1, pooled_h))
    z_w = jax.nn.relu(jnp.einsum("rc,ncw->nrw", w1, pooled_w))
    s_h = jax.nn.sigmoid(jnp.einsum("cr,nrh->nch", wh, z_h))
    s_w = jax.nn.sigmoid(jnp.einsum("cr,nrw->ncw", ww, z_w))
    return x * s_h[:, :, :, None] * s_w[:, :, None, :]


if __name__ == "__main__":
    N, C, H, W = 2, 32, 16, 16
    reduction = 16
    Cr = C // reduction

    key = jax.random.PRNGKey(0)
    kx, k1, kh, kw = jax.random.split(key, 4)
    x = jax.random.normal(kx, (N, C, H, W), dtype=jnp.float32)
    # 1x1 conv weights (kernel_size=1, bias=False) collapse to (out, in).
    w1 = jax.random.normal(k1, (Cr, C), dtype=jnp.float32) * 0.1   # conv_1x1
    wh = jax.random.normal(kh, (C, Cr), dtype=jnp.float32) * 0.1   # F_h
    ww = jax.random.normal(kw, (C, Cr), dtype=jnp.float32) * 0.1   # F_w

    ref = ca_block_ref(x, w1, wh, ww)

    # Primary (fused, single HBM read of x) path.
    out = jax.block_until_ready(jax.jit(ca_block)(x, w1, wh, ww))
    assert out.shape == (N, C, H, W)
    assert jnp.allclose(out, ref, atol=1e-4, rtol=1e-4), "fused path mismatch"

    # Also exercise the large-feature-map fallback (two-pass) path.
    out2 = jax.block_until_ready(
        jax.jit(functools.partial(ca_block, force_two_pass=True))(
            x, w1, wh, ww))
    assert jnp.allclose(out2, ref, atol=1e-4, rtol=1e-4), "two-pass mismatch"

    print("KERNEL_OK")
</pallas_src>

<mosaic_0001>
module attributes {stable_mosaic.version = 11 : i64} {
  func.func @_fused_kernel(%arg0: i32, %arg1: memref<1x32x256xf32, #tpu.memory_space<vmem>>, %arg2: memref<256x16xf32, #tpu.memory_space<vmem>>, %arg3: memref<256x16xf32, #tpu.memory_space<vmem>>, %arg4: memref<16x256xf32, #tpu.memory_space<vmem>>, %arg5: memref<16x256xf32, #tpu.memory_space<vmem>>, %arg6: memref<2x32xf32, #tpu.memory_space<vmem>>, %arg7: memref<32x2xf32, #tpu.memory_space<vmem>>, %arg8: memref<32x2xf32, #tpu.memory_space<vmem>>, %arg9: memref<1x32x256xf32, #tpu.memory_space<vmem>>) attributes {dimension_semantics = [#tpu.dimension_semantics<parallel>], iteration_bounds = array<i64: 2>, scalar_prefetch = 0 : i64, scratch_operands = 0 : i64, tpu.core_type = #tpu.core_type<tc>, window_params = [{transform_indices = @transform_0, window_bounds = array<i64: 1, 32, 256>}, {pipeline_mode = #tpu.pipeline_mode<synchronous>, transform_indices = @transform_1, window_bounds = array<i64: 256, 16>}, {pipeline_mode = #tpu.pipeline_mode<synchronous>, transform_indices = @transform_2, window_bounds = array<i64: 256, 16>}, {pipeline_mode = #tpu.pipeline_mode<synchronous>, transform_indices = @transform_3, window_bounds = array<i64: 16, 256>}, {pipeline_mode = #tpu.pipeline_mode<synchronous>, transform_indices = @transform_4, window_bounds = array<i64: 16, 256>}, {pipeline_mode = #tpu.pipeline_mode<synchronous>, transform_indices = @transform_5, window_bounds = array<i64: 2, 32>}, {pipeline_mode = #tpu.pipeline_mode<synchronous>, transform_indices = @transform_6, window_bounds = array<i64: 32, 2>}, {pipeline_mode = #tpu.pipeline_mode<synchronous>, transform_indices = @transform_7, window_bounds = array<i64: 32, 2>}, {transform_indices = @transform_8, window_bounds = array<i64: 1, 32, 256>}]} {
    %c0 = arith.constant 0 : index
    %c0_0 = arith.constant 0 : index
    %c0_1 = arith.constant 0 : index
    %0 = vector.load %arg1[%c0, %c0_0, %c0_1] : memref<1x32x256xf32, #tpu.memory_space<vmem>>, vector<1x32x256xf32>
    %1 = vector.shape_cast %0 : vector<1x32x256xf32> to vector<32x256xf32>
    %c0_2 = arith.constant 0 : index
    %c0_3 = arith.constant 0 : index
    %2 = vector.load %arg2[%c0_2, %c0_3] : memref<256x16xf32, #tpu.memory_space<vmem>>, vector<256x16xf32>
    %cst = arith.constant dense<0.000000e+00> : vector<32x16xf32>
    %3 = tpu.matmul %1, %2, %cst {dimension_numbers = #tpu.dot_dimension_numbers<[1], [0], [0], [1], [0, 0, 1, 1], [], []>} : vector<32x256xf32>, vector<256x16xf32>, vector<32x16xf32> -> vector<32x16xf32>
    %c0_4 = arith.constant 0 : index
    %c0_5 = arith.constant 0 : index
    %4 = vector.load %arg3[%c0_4, %c0_5] : memref<256x16xf32, #tpu.memory_space<vmem>>, vector<256x16xf32>
    %cst_6 = arith.constant dense<0.000000e+00> : vector<32x16xf32>
    %5 = tpu.matmul %1, %4, %cst_6 {dimension_numbers = #tpu.dot_dimension_numbers<[1], [0], [0], [1], [0, 0, 1, 1], [], []>} : vector<32x256xf32>, vector<256x16xf32>, vector<32x16xf32> -> vector<32x16xf32>
    %c0_7 = arith.constant 0 : index
    %c0_8 = arith.constant 0 : index
    %6 = vector.load %arg6[%c0_7, %c0_8] : memref<2x32xf32, #tpu.memory_space<vmem>>, vector<2x32xf32>
    %cst_9 = arith.constant dense<0.000000e+00> : vector<2x16xf32>
    %7 = tpu.matmul %6, %3, %cst_9 {dimension_numbers = #tpu.dot_dimension_numbers<[1], [0], [0], [1], [0, 0, 1, 1], [], []>} : vector<2x32xf32>, vector<32x16xf32>, vector<2x16xf32> -> vector<2x16xf32>
    %cst_10 = arith.constant 0.000000e+00 : f32
    %8 = vector.broadcast %cst_10 : f32 to vector<2x16xf32>
    %9 = arith.maximumf %7, %8 : vector<2x16xf32>
    %c0_11 = arith.constant 0 : index
    %c0_12 = arith.constant 0 : index
    %10 = vector.load %arg6[%c0_11, %c0_12] : memref<2x32xf32, #tpu.memory_space<vmem>>, vector<2x32xf32>
    %cst_13 = arith.constant dense<0.000000e+00> : vector<2x16xf32>
    %11 = tpu.matmul %10, %5, %cst_13 {dimension_numbers = #tpu.dot_dimension_numbers<[1], [0], [0], [1], [0, 0, 1, 1], [], []>} : vector<2x32xf32>, vector<32x16xf32>, vector<2x16xf32> -> vector<2x16xf32>
    %cst_14 = arith.constant 0.000000e+00 : f32
    %12 = vector.broadcast %cst_14 : f32 to vector<2x16xf32>
    %13 = arith.maximumf %11, %12 : vector<2x16xf32>
    %c0_15 = arith.constant 0 : index
    %c0_16 = arith.constant 0 : index
    %14 = vector.load %arg7[%c0_15, %c0_16] : memref<32x2xf32, #tpu.memory_space<vmem>>, vector<32x2xf32>
    %cst_17 = arith.constant dense<0.000000e+00> : vector<32x16xf32>
    %15 = tpu.matmul %14, %9, %cst_17 {dimension_numbers = #tpu.dot_dimension_numbers<[1], [0], [0], [1], [0, 0, 1, 1], [], []>} : vector<32x2xf32>, vector<2x16xf32>, vector<32x16xf32> -> vector<32x16xf32>
    %16 = arith.negf %15 : vector<32x16xf32>
    %17 = math.exp %16 : vector<32x16xf32>
    %cst_18 = arith.constant 1.000000e+00 : f32
    %18 = vector.broadcast %cst_18 : f32 to vector<32x16xf32>
    %19 = arith.addf %18, %17 : vector<32x16xf32>
    %20 = arith.divf %18, %19 : vector<32x16xf32>
    %c0_19 = arith.constant 0 : index
    %c0_20 = arith.constant 0 : index
    %21 = vector.load %arg8[%c0_19, %c0_20] : memref<32x2xf32, #tpu.memory_space<vmem>>, vector<32x2xf32>
    %cst_21 = arith.constant dense<0.000000e+00> : vector<32x16xf32>
    %22 = tpu.matmul %21, %13, %cst_21 {dimension_numbers = #tpu.dot_dimension_numbers<[1], [0], [0], [1], [0, 0, 1, 1], [], []>} : vector<32x2xf32>, vector<2x16xf32>, vector<32x16xf32> -> vector<32x16xf32>
    %23 = arith.negf %22 : vector<32x16xf32>
    %24 = math.exp %23 : vector<32x16xf32>
    %cst_22 = arith.constant 1.000000e+00 : f32
    %25 = vector.broadcast %cst_22 : f32 to vector<32x16xf32>
    %26 = arith.addf %25, %24 : vector<32x16xf32>
    %27 = arith.divf %25, %26 : vector<32x16xf32>
    %c0_23 = arith.constant 0 : index
    %c0_24 = arith.constant 0 : index
    %28 = vector.load %arg4[%c0_23, %c0_24] : memref<16x256xf32, #tpu.memory_space<vmem>>, vector<16x256xf32>
    %cst_25 = arith.constant dense<0.000000e+00> : vector<32x256xf32>
    %29 = tpu.matmul %20, %28, %cst_25 {dimension_numbers = #tpu.dot_dimension_numbers<[1], [0], [0], [1], [0, 0, 1, 1], [], []>} : vector<32x16xf32>, vector<16x256xf32>, vector<32x256xf32> -> vector<32x256xf32>
    %c0_26 = arith.constant 0 : index
    %c0_27 = arith.constant 0 : index
    %30 = vector.load %arg5[%c0_26, %c0_27] : memref<16x256xf32, #tpu.memory_space<vmem>>, vector<16x256xf32>
    %cst_28 = arith.constant dense<0.000000e+00> : vector<32x256xf32>
    %31 = tpu.matmul %27, %30, %cst_28 {dimension_numbers = #tpu.dot_dimension_numbers<[1], [0], [0], [1], [0, 0, 1, 1], [], []>} : vector<32x16xf32>, vector<16x256xf32>, vector<32x256xf32> -> vector<32x256xf32>
    %32 = arith.mulf %29, %31 : vector<32x256xf32>
    %33 = arith.mulf %1, %32 : vector<32x256xf32>
    %c0_29 = arith.constant 0 : index
    %c0_30 = arith.constant 0 : index
    %c0_31 = arith.constant 0 : index
    %34 = vector.load %arg9[%c0_29, %c0_30, %c0_31] : memref<1x32x256xf32, #tpu.memory_space<vmem>>, vector<1x32x256xf32>
    %35 = vector.shape_cast %34 : vector<1x32x256xf32> to vector<32x256xf32>
    %36 = vector.shape_cast %33 : vector<32x256xf32> to vector<1x32x256xf32>
    tpu.vector_store %arg9[%c0_29, %c0_30, %c0_31], %36 {strides = array<i32>} : memref<1x32x256xf32, #tpu.memory_space<vmem>>, vector<1x32x256xf32>,
    return
  }
  func.func @transform_0(%arg0: i32) -> (i32, i32, i32) {
    %c0_i32 = arith.constant 0 : i32
    %c0_i32_0 = arith.constant 0 : i32
    %c0_i32_1 = arith.constant 0 : i32
    return %arg0, %c0_i32, %c0_i32_0 : i32, i32, i32
  }
  func.func @transform_1(%arg0: i32) -> (i32, i32) {
    %c0_i32 = arith.constant 0 : i32
    %c0_i32_0 = arith.constant 0 : i32
    %c0_i32_1 = arith.constant 0 : i32
    return %c0_i32, %c0_i32_0 : i32, i32
  }
  func.func @transform_2(%arg0: i32) -> (i32, i32) {
    %c0_i32 = arith.constant 0 : i32
    %c0_i32_0 = arith.constant 0 : i32
    %c0_i32_1 = arith.constant 0 : i32
    return %c0_i32, %c0_i32_0 : i32, i32
  }
  func.func @transform_3(%arg0: i32) -> (i32, i32) {
    %c0_i32 = arith.constant 0 : i32
    %c0_i32_0 = arith.constant 0 : i32
    %c0_i32_1 = arith.constant 0 : i32
    return %c0_i32, %c0_i32_0 : i32, i32
  }
  func.func @transform_4(%arg0: i32) -> (i32, i32) {
    %c0_i32 = arith.constant 0 : i32
    %c0_i32_0 = arith.constant 0 : i32
    %c0_i32_1 = arith.constant 0 : i32
    return %c0_i32, %c0_i32_0 : i32, i32
  }
  func.func @transform_5(%arg0: i32) -> (i32, i32) {
    %c0_i32 = arith.constant 0 : i32
    %c0_i32_0 = arith.constant 0 : i32
    %c0_i32_1 = arith.constant 0 : i32
    return %c0_i32, %c0_i32_0 : i32, i32
  }
  func.func @transform_6(%arg0: i32) -> (i32, i32) {
    %c0_i32 = arith.constant 0 : i32
    %c0_i32_0 = arith.constant 0 : i32
    %c0_i32_1 = arith.constant 0 : i32
    return %c0_i32, %c0_i32_0 : i32, i32
  }
  func.func @transform_7(%arg0: i32) -> (i32, i32) {
    %c0_i32 = arith.constant 0 : i32
    %c0_i32_0 = arith.constant 0 : i32
    %c0_i32_1 = arith.constant 0 : i32
    return %c0_i32, %c0_i32_0 : i32, i32
  }
  func.func @transform_8(%arg0: i32) -> (i32, i32, i32) {
    %c0_i32 = arith.constant 0 : i32
    %c0_i32_0 = arith.constant 0 : i32
    %c0_i32_1 = arith.constant 0 : i32
    return %arg0, %c0_i32, %c0_i32_0 : i32, i32, i32
  }
}

</mosaic_0001>

<bundles_post_ra>
// kernel: ca_block.1
= control target key start
LH: loop header
LB: loop body
LE: loop exit
PB: predicated region body
PF: predicated region fallthrough
CT: control target
= control target key end

     0   :  { %s1613_s27 = smov 0   ;;  %s1976_s0 = inlined_call_operand.vmem [shape: f32[2,32,256], index: 0, kind: input, shape index: {}]   ;;  %s1977_s1 = inlined_call_operand.vmem [shape: f32[256,16], index: 1, kind: input, shape index: {}]   ;;  %s1978_s2 = inlined_call_operand.vmem [shape: f32[256,16], index: 2, kind: input, shape index: {}]   ;;  %s1979_s3 = inlined_call_operand.vmem [shape: f32[16,256], index: 3, kind: input, shape index: {}]   ;;  %s1980_s4 = inlined_call_operand.vmem [shape: f32[16,256], index: 4, kind: input, shape index: {}]   ;;  %s1981_s5 = inlined_call_operand.vmem [shape: f32[2,32], index: 5, kind: input, shape index: {}]   ;;  %s1982_s6 = inlined_call_operand.vmem [shape: f32[32,2], index: 6, kind: input, shape index: {}]   ;;  %s1983_s7 = inlined_call_operand.vmem [shape: f32[32,2], index: 7, kind: input, shape index: {}]   ;;  %s1984_s8 = inlined_call_operand.vmem [shape: f32[2,32,256], index: 8, kind: output, shape index: {}]  }
   0x1 LB: > { %s1243_s28 = sadd.s32 4294967295, %s1563_s27   ;;  %p1247_p0 = scmp.ge.s32.totalorder %s1563_s27, 1  ;;  %s1563_s27 = sphi %s1613_s27, %s18_s27  }
   0x2   : > { %p262_p1 = scmp.lt.s32.totalorder %s1563_s27, 3 }
   0x4   : > { %p263_p2 = pnand %p1247_p0, %p262_p1 }
   0x5   : > { %v330_v0 = vld [vmem:[%s1977_s1 + $0x80] sm:$0xff] (!%p263_p2)  ;;  %v331_v1 = vld [vmem:[%s1977_s1 + $0x88] sm:$0xff] (!%p263_p2)  ;;  %v332_v11 = vld [vmem:[%s1977_s1 + $0x90] sm:$0xff] (!%p263_p2)  ;;  %p1695_p3 = scmp.lt.s32.totalorder (!%p263_p2), %s1243_s28, 1  ;;  %vm1566_vm0 = vmmov (!%p263_p2), 0   ;;  %vm549_vm1 = vcmask (!%p263_p2), 261120  }
   0x6   : > { %266 = sbr.rel (%p263_p2) target bundleno = 960 (0x3c0), region = 52  ;;  %v447_v2 = vld [vmem:[%s1978_s2 + $0x80] sm:$0xff] (!%p263_p2)  ;;  %v1430_v3 = vpack.c.bf16 (!%p263_p2), %v331_v1, %v330_v0  ;;  %v448_v4 = vld [vmem:[%s1978_s2 + $0x88] sm:$0xff] (!%p263_p2)  ;;  %v333_v13 = vld [vmem:[%s1977_s1 + $0x98] sm:$0xff] (!%p263_p2)  ;;  %vm699_vm2 = vcmask (!%p263_p2), 15360   ;;  %vm712_vm3 = vcmask (!%p263_p2), 1041408  }
   0x7   : > { %v314_v5 = vld [vmem:[%s1977_s1] sm:$0xff] (!%p263_p2)  ;;  %v315_v6 = vld [vmem:[%s1977_s1 + $0x8] sm:$0xff] (!%p263_p2)  ;;  %v1462_v7 = vpack.c.bf16 (!%p263_p2), %v448_v4, %v447_v2  ;;  %v449_v14 = vld [vmem:[%s1978_s2 + $0x90] sm:$0xff] (!%p263_p2)  ;;  %v1434_v16 = vpack.c.bf16 (!%p263_p2), %v333_v13, %v332_v11  ;;  %vm957_vm4 = vcmask (!%p263_p2), 130048  }
   0x8   : > { %v1432_v8 = vpack.c.bf16 (!%p263_p2), %v315_v6, %v314_v5  ;;  %v431_v9 = vld [vmem:[%s1978_s2] sm:$0xff] (!%p263_p2)  ;;  %v432_v10 = vld [vmem:[%s1978_s2 + $0x8] sm:$0xff] (!%p263_p2)  ;;  %1431 = vmatprep.subr.bf16.mxu0 (!%p263_p2), %v1430_v3  ;;  %v450_v15 = vld [vmem:[%s1978_s2 + $0x98] sm:$0xff] (!%p263_p2) }
   0x9   : > { %v1464_v12 = vpack.c.bf16 (!%p263_p2), %v432_v10, %v431_v9  ;;  %1463 = vmatprep.subr.bf16.mxu1 (!%p263_p2), %v1462_v7  ;;  %v1466_v17 = vpack.c.bf16 (!%p263_p2), %v450_v15, %v449_v14  ;;  %v316_v18 = vld [vmem:[%s1977_s1 + $0x10] sm:$0xff] (!%p263_p2)  ;;  %v317_v19 = vld [vmem:[%s1977_s1 + $0x18] sm:$0xff] (!%p263_p2)  ;;  %v334_v23 = vld [vmem:[%s1977_s1 + $0xa0] sm:$0xff] (!%p263_p2) }
   0xa   : > { %1433 = vmatpush3.bf16.msra.mxu0 (!%p263_p2), %v1432_v8  ;;  %v433_v20 = vld [vmem:[%s1978_s2 + $0x10] sm:$0xff] (!%p263_p2)  ;;  %v1436_v21 = vpack.c.bf16 (!%p263_p2), %v317_v19, %v316_v18  ;;  %v434_v22 = vld [vmem:[%s1978_s2 + $0x18] sm:$0xff] (!%p263_p2)  ;;  %v335_v24 = vld [vmem:[%s1977_s1 + $0xa8] sm:$0xff] (!%p263_p2) }
   0xb   : > { %1465 = vmatpush3.bf16.msra.mxu1 (!%p263_p2), %v1464_v12  ;;  %1435 = vmatprep.subr.bf16.mxu0 (!%p263_p2), %v1434_v16  ;;  %v1468_v25 = vpack.c.bf16 (!%p263_p2), %v434_v22, %v433_v20  ;;  %v1438_v26 = vpack.c.bf16 (!%p263_p2), %v335_v24, %v334_v23  ;;  %v451_v27 = vld [vmem:[%s1978_s2 + $0xa0] sm:$0xff] (!%p263_p2)  ;;  %v452_v28 = vld [vmem:[%s1978_s2 + $0xa8] sm:$0xff] (!%p263_p2)  ;;  %v336_v35 = vld [vmem:[%s1977_s1 + $0xb0] sm:$0xff] (!%p263_p2) }
   0xc   : > { %1467 = vmatprep.subr.bf16.mxu1 (!%p263_p2), %v1466_v17  ;;  %v318_v29 = vld [vmem:[%s1977_s1 + $0x20] sm:$0xff] (!%p263_p2)  ;;  %v1470_v30 = vpack.c.bf16 (!%p263_p2), %v452_v28, %v451_v27  ;;  %v319_v31 = vld [vmem:[%s1977_s1 + $0x28] sm:$0xff] (!%p263_p2)  ;;  %v337_v36 = vld [vmem:[%s1977_s1 + $0xb8] sm:$0xff] (!%p263_p2) }
   0xd   : > { %v435_v32 = vld [vmem:[%s1978_s2 + $0x20] sm:$0xff]  ;;  %v436_v33 = vld [vmem:[%s1978_s2 + $0x28] sm:$0xff]  ;;  %v1440_v34 = vpack.c.bf16 %v319_v31, %v318_v29  ;;  %v453_v37 = vld [vmem:[%s1978_s2 + $0xb0] sm:$0xff]  ;;  %v1442_v39 = vpack.c.bf16 %v337_v36, %v336_v35  ;;  %s1987_s28 = smov (!%p1695_p3, %s1243_s28), 1 }
   0xe   : > { %1437 = vmatpush3.bf16.msra.mxu0 %v1436_v21  ;;  %v1472_v38 = vpack.c.bf16 %v436_v33, %v435_v32  ;;  %v454_v40 = vld [vmem:[%s1978_s2 + $0xb8] sm:$0xff]  ;;  %v320_v41 = vld [vmem:[%s1977_s1 + $0x30] sm:$0xff]  ;;  %v338_v46 = vld [vmem:[%s1977_s1 + $0xc0] sm:$0xff]  ;;  %s1282_s17 = sshll.u32 %s1987_s28, 6 }
   0xf   : > { %1469 = vmatpush3.bf16.msra.mxu1 %v1468_v25  ;;  %1439 = vmatprep.subr.bf16.mxu0 %v1438_v26  ;;  %v321_v42 = vld [vmem:[%s1977_s1 + $0x38] sm:$0xff]  ;;  %v1474_v43 = vpack.c.bf16 %v454_v40, %v453_v37  ;;  %v437_v44 = vld [vmem:[%s1978_s2 + $0x30] sm:$0xff]  ;;  %v339_v47 = vld [vmem:[%s1977_s1 + $0xc8] sm:$0xff]  ;;  %s1789_s11 = scalar_lea.vmem %s1976_s0, %s1282_s17  ;;  %v1565_v40 = vmov 0.0|0.0   ;;  %s1955_s22 = scalar_lea.vmem %s1984_s8, %s1282_s17 }
  0x10   : > { %1471 = vmatprep.subr.bf16.mxu1 %v1470_v30  ;;  %v438_v45 = vld [vmem:[%s1978_s2 + $0x38] sm:$0xff]  ;;  %v455_v48 = vld [vmem:[%s1978_s2 + $0xc0] sm:$0xff]  ;;  %v456_v49 = vld [vmem:[%s1978_s2 + $0xc8] sm:$0xff]  ;;  %v1444_v50 = vpack.c.bf16 %v321_v42, %v320_v41  ;;  %v1446_v52 = vpack.c.bf16 %v339_v47, %v338_v46  ;;  %v1567_v41 = vmov 0.0  }
  0x11   : > { %v1476_v51 = vpack.c.bf16 %v438_v45, %v437_v44  ;;  %v322_v53 = vld [vmem:[%s1977_s1 + $0x40] sm:$0xff]  ;;  %v323_v54 = vld [vmem:[%s1977_s1 + $0x48] sm:$0xff]  ;;  %v1478_v56 = vpack.c.bf16 %v456_v49, %v455_v48  ;;  %v340_v58 = vld [vmem:[%s1977_s1 + $0xd0] sm:$0xff] }
  0x12   : > { %1441 = vmatpush3.bf16.msra.mxu0 %v1440_v34  ;;  %v439_v55 = vld [vmem:[%s1978_s2 + $0x40] sm:$0xff]  ;;  %v440_v57 = vld [vmem:[%s1978_s2 + $0x48] sm:$0xff]  ;;  %v341_v59 = vld [vmem:[%s1977_s1 + $0xd8] sm:$0xff]  ;;  %v1448_v62 = vpack.c.bf16 %v323_v54, %v322_v53 }
  0x13   : > { %1473 = vmatpush3.bf16.msra.mxu1 %v1472_v38  ;;  %1443 = vmatprep.subr.bf16.mxu0 %v1442_v39  ;;  %v457_v60 = vld [vmem:[%s1978_s2 + $0xd0] sm:$0xff]  ;;  %v458_v61 = vld [vmem:[%s1978_s2 + $0xd8] sm:$0xff]  ;;  %v1480_v63 = vpack.c.bf16 %v440_v57, %v439_v55  ;;  %v1450_v0 = vpack.c.bf16 %v341_v59, %v340_v58  ;;  %v342_v6 = vld [vmem:[%s1977_s1 + $0xe0] sm:$0xff] }
  0x14   : > { %1475 = vmatprep.subr.bf16.mxu1 %v1474_v43  ;;  %v324_v1 = vld [vmem:[%s1977_s1 + $0x50] sm:$0xff]  ;;  %v325_v2 = vld [vmem:[%s1977_s1 + $0x58] sm:$0xff]  ;;  %v1482_v4 = vpack.c.bf16 %v458_v61, %v457_v60  ;;  %v343_v7 = vld [vmem:[%s1977_s1 + $0xe8] sm:$0xff] }
  0x15   : > { %v441_v3 = vld [vmem:[%s1978_s2 + $0x50] sm:$0xff]  ;;  %v442_v5 = vld [vmem:[%s1978_s2 + $0x58] sm:$0xff]  ;;  %v459_v8 = vld [vmem:[%s1978_s2 + $0xe0] sm:$0xff]  ;;  %v1452_v10 = vpack.c.bf16 %v325_v2, %v324_v1  ;;  %v1454_v13 = vpack.c.bf16 %v343_v7, %v342_v6 }
  0x16   : > { %1445 = vmatpush3.bf16.msra.mxu0 %v1444_v50  ;;  %v460_v9 = vld [vmem:[%s1978_s2 + $0xe8] sm:$0xff]  ;;  %v326_v11 = vld [vmem:[%s1977_s1 + $0x60] sm:$0xff]  ;;  %v1484_v12 = vpack.c.bf16 %v442_v5, %v441_v3  ;;  %v344_v19 = vld [vmem:[%s1977_s1 + $0xf0] sm:$0xff] }
  0x17   : > { %1477 = vmatpush3.bf16.msra.mxu1 %v1476_v51  ;;  %1447 = vmatprep.subr.bf16.mxu0 %v1446_v52  ;;  %v327_v14 = vld [vmem:[%s1977_s1 + $0x68] sm:$0xff]  ;;  %v443_v15 = vld [vmem:[%s1978_s2 + $0x60] sm:$0xff]  ;;  %v1486_v17 = vpack.c.bf16 %v460_v9, %v459_v8  ;;  %v345_v20 = vld [vmem:[%s1977_s1 + $0xf8] sm:$0xff] }
  0x18   : > { %1479 = vmatprep.subr.bf16.mxu1 %v1478_v56  ;;  %v1807_v16 = vld [vmem:[%s1789_s11 + $0x8] sm:$0xff]  ;;  %v461_v21 = vld [vmem:[%s1978_s2 + $0xf0] sm:$0xff]  ;;  %v462_v22 = vld [vmem:[%s1978_s2 + $0xf8] sm:$0xff]  ;;  %v1456_v23 = vpack.c.bf16 %v327_v14, %v326_v11  ;;  %v1458_v25 = vpack.c.bf16 %v345_v20, %v344_v19 }
  0x19   : > { %v444_v18 = vld [vmem:[%s1978_s2 + $0x68] sm:$0xff]  ;;  %410 = vmatprep.mubr.f32.mxu0 %v1807_v16  ;;  %527 = vmatprep.mubr.f32.mxu1 %v1807_v16  ;;  %v328_v26 = vld [vmem:[%s1977_s1 + $0x70] sm:$0xff]  ;;  %v329_v27 = vld [vmem:[%s1977_s1 + $0x78] sm:$0xff]  ;;  %v1490_v28 = vpack.c.bf16 %v462_v22, %v461_v21 }
  0x1a   : > { %1449 = vmatpush3.bf16.msra.mxu0 %v1448_v62  ;;  %v1488_v24 = vpack.c.bf16 %v444_v18, %v443_v15  ;;  %v445_v29 = vld [vmem:[%s1978_s2 + $0x70] sm:$0xff]  ;;  %v446_v30 = vld [vmem:[%s1978_s2 + $0x78] sm:$0xff]  ;;  %v1460_v31 = vpack.c.bf16 %v329_v27, %v328_v26  ;;  %v1839_v33 = vld [vmem:[%s1789_s11] sm:$0xff] }
  0x1b   : > { %1481 = vmatpush3.bf16.msra.mxu1 %v1480_v63  ;;  %1451 = vmatprep.subr.bf16.mxu0 %v1450_v0  ;;  %v1492_v32 = vpack.c.bf16 %v446_v30, %v445_v29  ;;  %v1842_v34 = vld [vmem:[%s1789_s11 + $0x18] sm:$0xff]  ;;  %v1848_v35 = vld [vmem:[%s1789_s11 + $0x10] sm:$0xff]  ;;  %v1852_v36 = vld [vmem:[%s1789_s11 + $0x28] sm:$0xff] }
  0x1c   : > { %1483 = vmatprep.subr.bf16.mxu1 %v1482_v4  ;;  %v1858_v37 = vld [vmem:[%s1789_s11 + $0x20] sm:$0xff]  ;;  %v1862_v38 = vld [vmem:[%s1789_s11 + $0x38] sm:$0xff]  ;;  %v1868_v39 = vld [vmem:[%s1789_s11 + $0x30] sm:$0xff] }
  0x1d   : > { %v548_v6 = vld [vmem:[%s1981_s5] sm:$0x3]  ;;  %v696_v15 = vld [vmem:[%s1982_s6 + $0x8] sm:$0xff]  ;;  %v697_v18 = vld [vmem:[%s1982_s6 + $0x10] sm:$0xff] }
  0x1e   : > { %1453 = vmatpush3.bf16.msra.mxu0 %v1452_v10  ;;  %v695_v7 = vld [vmem:[%s1982_s6] sm:$0xff]  ;;  %v827_v19 = vld [vmem:[%s1983_s7 + $0x10] sm:$0xff]  ;;  %v698_v20 = vld [vmem:[%s1982_s6 + $0x18] sm:$0xff] }
  0x1f   : > { %1485 = vmatpush3.bf16.msra.mxu1 %v1484_v12  ;;  %1455 = vmatprep.subr.bf16.mxu0 %v1454_v13  ;;  %v825_v8 = vld [vmem:[%s1983_s7] sm:$0xff]  ;;  %v828_v21 = vld [vmem:[%s1983_s7 + $0x18] sm:$0xff]  ;;  %v954_v22 = vld [vmem:[%s1979_s3 + $0x8] sm:$0xff] }
  0x20   : > { %1487 = vmatprep.subr.bf16.mxu1 %v1486_v17  ;;  %v826_v17 = vld [vmem:[%s1983_s7 + $0x8] sm:$0xff]  ;;  %v1062_v26 = vld [vmem:[%s1980_s4 + $0x18] sm:$0xff]  ;;  %v953_v27 = vld [vmem:[%s1979_s3] sm:$0xff] }
  0x22   : > { %1457 = vmatpush3.bf16.msra.mxu0 %v1456_v23  ;;  %v956_v23 = vld [vmem:[%s1979_s3 + $0x18] sm:$0xff] }
  0x23   : > { %1489 = vmatpush3.bf16.msra.mxu1 %v1488_v24  ;;  %1459 = vmatprep.subr.bf16.mxu0 %v1458_v25  ;;  %v1060_v24 = vld [vmem:[%s1980_s4 + $0x8] sm:$0xff]  ;;  %v1506_v25 = vpack.c.bf16 %v956_v23, %v954_v22 }
  0x24   : > { %1491 = vmatprep.subr.bf16.mxu1 %v1490_v28  ;;  %v955_v28 = vld [vmem:[%s1979_s3 + $0x10] sm:$0xff]  ;;  %v1510_v29 = vpack.c.bf16 %v1062_v26, %v1060_v24 }
  0x25   : > { %v1508_v30 = vpack.c.bf16 %v955_v28, %v953_v27 }
  0x26   : > { %1461 = vmatpush3.bf16.msra.mxu0 %v1460_v31  ;;  %v1059_v31 = vld [vmem:[%s1980_s4] sm:$0xff] }
  0x27   : > { %1493 = vmatpush3.bf16.msra.mxu1 %v1492_v32  ;;  %1494 = vmatprep.subr.bf16.mxu0 %v1565_v40  ;;  %v1061_v32 = vld [vmem:[%s1980_s4 + $0x10] sm:$0xff] }
  0x28   : > { %1500 = vmatprep.subr.bf16.mxu1 %v1565_v40 }
  0x29   : > { %411 = vmatmul.mubr.f32.vlgmr.msra.gmra.mrb[0].mxu0 %v1839_v33 }
  0x2a   : > { %528 = vmatmul.mubr.f32.vlgmr.msra.gmra.mrb[0].mxu1 %v1839_v33  ;;  %415 = vmatprep.mubr.f32.mxu0 %v1842_v34 }
  0x2b   : > { %532 = vmatprep.mubr.f32.mxu1 %v1842_v34 }
  0x2d   : > { %416 = vmatmul.mubr.f32.gmra.mrb[2].mxu0 %v1848_v35 }
  0x2e   : > { %533 = vmatmul.mubr.f32.gmra.mrb[2].mxu1 %v1848_v35  ;;  %420 = vmatprep.mubr.f32.mxu0 %v1852_v36 }
  0x2f   : > { %537 = vmatprep.mubr.f32.mxu1 %v1852_v36 }
  0x31   : > { %421 = vmatmul.mubr.f32.gmra.mrb[4].mxu0 %v1858_v37 }
  0x32   : > { %538 = vmatmul.mubr.f32.gmra.mrb[4].mxu1 %v1858_v37  ;;  %425 = vmatprep.mubr.f32.mxu0 %v1862_v38 }
  0x33   : > { %542 = vmatprep.mubr.f32.mxu1 %v1862_v38 }
  0x35   : > { %426 = vmatmul.mubr.f32.gmra.mrb[6].mxu0 %v1868_v39 }
  0x36   : > { %543 = vmatmul.mubr.f32.gmra.mrb[6].mxu1 %v1868_v39  ;;  %1400 = vmatprep.mubr.msk.f32.mxu0 %vm1566_vm0, %v1567_v41 }
  0x37   : > { %1411 = vmatprep.mubr.msk.f32.mxu1 %vm1566_vm0, %v1567_v41 }
  0xfc   : > { %v1316_v42 = vpop.f32.mrb[0].mxu0 }
  0xfd   : > { %v1360_v43 = vpop.f32.mrb[0].mxu1  ;;  %v1317_v44 = vpop.f32.mrb[1].mxu0 }
  0xfe   : > { %v1318_v45 = vadd.f32 %v1317_v44, %v1316_v42  ;;  %v1361_v46 = vpop.f32.mrb[1].mxu1 }
  0xff   : > { %v1362_v47 = vadd.f32 %v1361_v46, %v1360_v43 }
 0x100   : > { %v1319_v48 = vpop.f32.mrb[2].mxu0 }
 0x101   : > { %v1363_v49 = vpop.f32.mrb[2].mxu1  ;;  %v1320_v50 = vpop.f32.mrb[3].mxu0 }
 0x102   : > { %v1321_v51 = vadd.f32 %v1320_v50, %v1319_v48  ;;  %v1364_v52 = vpop.f32.mrb[3].mxu1 }
 0x103   : > { %v1365_v53 = vadd.f32 %v1364_v52, %v1363_v49 }
 0x104   : > { %v1495_v54 = vpack.c.bf16 %v1321_v51, %v1318_v45  ;;  %v1322_v55 = vpop.f32.mrb[4].mxu0 }
 0x105   : > { %v1501_v56 = vpack.c.bf16 %v1365_v53, %v1362_v47  ;;  %v1366_v57 = vpop.f32.mrb[4].mxu1  ;;  %v1323_v58 = vpop.f32.mrb[5].mxu0 }
 0x106   : > { %v1324_v59 = vadd.f32 %v1323_v58, %v1322_v55  ;;  %v1367_v60 = vpop.f32.mrb[5].mxu1  ;;  %1496 = vmatpush3.bf16.msra.mxu0 %v1495_v54 }
 0x107   : > { %v1368_v61 = vadd.f32 %v1367_v60, %v1366_v57  ;;  %1502 = vmatpush3.bf16.msra.mxu1 %v1501_v56  ;;  %1497 = vmatprep.subr.bf16.mxu0 %v1565_v40 }
 0x108   : > { %v1325_v62 = vpop.f32.mrb[6].mxu0  ;;  %1503 = vmatprep.subr.bf16.mxu1 %v1565_v40  ;;  %v1512_v40 = vpack.c.bf16 %v1061_v32, %v1059_v31 }
 0x109   : > { %v1369_v63 = vpop.f32.mrb[6].mxu1  ;;  %v1326_v0 = vpop.f32.mrb[7].mxu0 }
 0x10a   : > { %v1327_v1 = vadd.f32 %v1326_v0, %v1325_v62  ;;  %v1370_v2 = vpop.f32.mrb[7].mxu1 }
 0x10b   : > { %v1371_v3 = vadd.f32 %v1370_v2, %v1369_v63 }
 0x10c   : > { %v1498_v4 = vpack.c.bf16 %v1327_v1, %v1324_v59 }
 0x10d   : > { %v1504_v5 = vpack.c.bf16 %v1371_v3, %v1368_v61 }
 0x10e   : > { %1499 = vmatpush3.bf16.msra.mxu0 %v1498_v4 }
 0x10f   : > { %1505 = vmatpush3.bf16.msra.mxu1 %v1504_v5 }
 0x111   : > { %1401 = vmatmul.mubr.msk.f32.vlgmr.msra.gmra.mrb[8].mxu0 %vm549_vm1, %v548_v6 }
 0x112   : > { %1412 = vmatmul.mubr.msk.f32.vlgmr.msra.gmra.mrb[8].mxu1 %vm549_vm1, %v548_v6  ;;  %1416 = vmatprep.mubr.msk.f32.mxu0 %vm699_vm2, %v695_v7 }
 0x113   : > { %1424 = vmatprep.mubr.msk.f32.mxu1 %vm699_vm2, %v825_v8 }
 0x1e4   : > { %v619_v9 = vpop.f32.mrb[8].mxu0 }
 0x1e5   : > { %v623_v10 = vmax.f32 %v619_v9, 0.0  ;;  %v690_v11 = vpop.f32.mrb[8].mxu1  ;;  %v1402_v12 = vpop.f32.mrb[9].mxu0 }
 0x1e6   : > { %v694_v13 = vmax.f32 %v690_v11, 0.0  ;;  %v1413_v14 = vpop.f32.mrb[9].mxu1 }
 0x1e7   : > { %1414 = vmatprep.subr.msk.mxu0 %vm712_vm3, %v623_v10 }
 0x1e8   : > { %1422 = vmatprep.subr.msk.mxu1 %vm712_vm3, %v694_v13  ;;  %1415 = vmatpush3.msk.msra.mxu0 %vm712_vm3, %v623_v10 }
 0x1e9   : > { %1423 = vmatpush3.msk.msra.mxu1 %vm712_vm3, %v694_v13  ;;  %1417 = vmatmul.mubr.msk.f32.vlgmr.msra.gmra.mrb[10].mxu0 %vm699_vm2, %v696_v15 }
 0x1ea   : > { %1425 = vmatmul.mubr.msk.f32.vlgmr.msra.gmra.mrb[10].mxu1 %vm699_vm2, %v826_v17  ;;  %1419 = vmatprep.mubr.msk.f32.mxu0 %vm699_vm2, %v697_v18 }
 0x1eb   : > { %1427 = vmatprep.mubr.msk.f32.mxu1 %vm699_vm2, %v827_v19  ;;  %1507 = vmatprep.subr.bf16.mxu0 %v1506_v25 }
 0x1ec   : > { %1511 = vmatprep.subr.bf16.mxu1 %v1510_v29  ;;  %1509 = vmatpush1.bf16.msra.mxu0 %v1508_v30 }
 0x1ed   : > { %1420 = vmatmul.mubr.msk.f32.gmra.mrb[12].mxu0 %vm699_vm2, %v698_v20  ;;  %1513 = vmatpush1.bf16.msra.mxu1 %v1512_v40 }
 0x1ee   : > { %1428 = vmatmul.mubr.msk.f32.gmra.mrb[12].mxu1 %vm699_vm2, %v828_v21  ;;  %1034 = vmatprep.mubr.f32.mxu0 %v1567_v41 }
 0x1ef   : > { %1139 = vmatprep.mubr.f32.mxu1 %v1567_v41 }
 0x2bc   : > { %v1418_v42 = vpop.f32.mrb[10].mxu0 }
 0x2bd   : > { %v1260_v43 = vmul.f32 -1.442695, %v1418_v42  ;;  %v1426_v44 = vpop.f32.mrb[10].mxu1  ;;  %v782_v45 = vpop.f32.mrb[11].mxu0 }
 0x2be   : > { %v1269_v46 = vmul.f32 -1.442695, %v1426_v44  ;;  %v1259_v47 = vmul.f32 -1.442695, %v782_v45  ;;  %v910_v48 = vpop.f32.mrb[11].mxu1 }
 0x2bf   : > { %1525 = vpow2.f32 %v1260_v43  ;;  %v1268_v49 = vmul.f32 -1.442695, %v910_v48 }
 0x2c0   : > { %1527 = vpow2.f32 %v1269_v46  ;;  %v1421_v50 = vpop.f32.mrb[12].mxu0 }
 0x2c1   : > { %1529 = vpow2.f32 %v1259_v47  ;;  %v1429_v51 = vpop.f32.mrb[12].mxu1  ;;  %v792_v52 = vpop.f32.mrb[13].mxu0  ;;  %v1262_v56 = vmul.f32 -1.442695, %v1421_v50 }
 0x2c2   : > { %1531 = vpow2.f32 %v1268_v49  ;;  %v1261_v53 = vmul.f32 -1.442695, %v792_v52  ;;  %v920_v54 = vpop.f32.mrb[13].mxu1  ;;  %v1271_v57 = vmul.f32 -1.442695, %v1429_v51 }
 0x2c3   : > { %v1270_v55 = vmul.f32 -1.442695, %v920_v54 }
 0x2c4   : > { %1533 = vpow2.f32 %v1261_v53 }
 0x2c5   : > { %1535 = vpow2.f32 %v1270_v55 }
 0x2c6   : > { %1537 = vpow2.f32 %v1262_v56 }
 0x2c7   : > { %1539 = vpow2.f32 %v1271_v57 }
 0x2c9   : > { %v1526_v58 = vpop.eup %1525 }
 0x2ca   : > { %v1528_v59 = vpop.eup %1527  ;;  %v814_v0 = vadd.f32 1.0, %v1526_v58 }
 0x2cb   : > { %v1530_v60 = vpop.eup %1529  ;;  %v942_v2 = vadd.f32 1.0, %v1528_v59 }
 0x2cc   : > { %v1532_v61 = vpop.eup %1531  ;;  %v813_v62 = vadd.f32 1.0, %v1530_v60 }
 0x2cd   : > { %v941_v63 = vadd.f32 1.0, %v1532_v61 }
 0x2ce   : > { %1541 = vrcp.f32 %v813_v62  ;;  %v1534_v1 = vpop.eup %1533 }
 0x2cf   : > { %1543 = vrcp.f32 %v941_v63  ;;  %v1536_v3 = vpop.eup %1535  ;;  %v815_v4 = vadd.f32 1.0, %v1534_v1 }
 0x2d0   : > { %v943_v5 = vadd.f32 1.0, %v1536_v3  ;;  %1545 = vrcp.f32 %v814_v0  ;;  %v1538_v6 = vpop.eup %1537 }
 0x2d1   : > { %1547 = vrcp.f32 %v942_v2  ;;  %v1540_v7 = vpop.eup %1539  ;;  %v816_v8 = vadd.f32 1.0, %v1538_v6 }
 0x2d2   : > { %1549 = vrcp.f32 %v815_v4  ;;  %v944_v9 = vadd.f32 1.0, %v1540_v7 }
 0x2d3   : > { %1551 = vrcp.f32 %v943_v5 }
 0x2d4   : > { %1553 = vrcp.f32 %v816_v8 }
 0x2d5   : > { %1555 = vrcp.f32 %v944_v9 }
 0x2d8   : > { %v1542_v10 = vpop.eup %1541 }
 0x2d9   : > { %v1544_v11 = vpop.eup %1543  ;;  %1272 = vmatmul.mubr.msk.f32.vlgmr.msra.gmra.mrb[14].mxu0 %vm957_vm4, %v1542_v10 }
 0x2da   : > { %1276 = vmatmul.mubr.msk.f32.vlgmr.msra.gmra.mrb[14].mxu1 %vm957_vm4, %v1544_v11  ;;  %1040 = vmatprep.mubr.f32.mxu0 %v1567_v41  ;;  %v1546_v12 = vpop.eup %1545 }
 0x2db   : > { %1145 = vmatprep.mubr.f32.mxu1 %v1567_v41  ;;  %v1548_v13 = vpop.eup %1547 }
 0x2dc   : > { %v1550_v14 = vpop.eup %1549 }
 0x2dd   : > { %1273 = vmatmul.mubr.msk.f32.gmra.mrb[16].mxu0 %vm957_vm4, %v1546_v12  ;;  %v1552_v15 = vpop.eup %1551 }
 0x2de   : > { %1277 = vmatmul.mubr.msk.f32.gmra.mrb[16].mxu1 %vm957_vm4, %v1548_v13  ;;  %1046 = vmatprep.mubr.f32.mxu0 %v1567_v41  ;;  %v1554_v17 = vpop.eup %1553 }
 0x2df   : > { %1151 = vmatprep.mubr.f32.mxu1 %v1567_v41  ;;  %v1556_v18 = vpop.eup %1555 }
 0x2e1   : > { %1274 = vmatmul.mubr.msk.f32.gmra.mrb[18].mxu0 %vm957_vm4, %v1550_v14 }
 0x2e2   : > { %1278 = vmatmul.mubr.msk.f32.gmra.mrb[18].mxu1 %vm957_vm4, %v1552_v15  ;;  %1052 = vmatprep.mubr.f32.mxu0 %v1567_v41 }
 0x2e3   : > { %1157 = vmatprep.mubr.f32.mxu1 %v1567_v41 }
 0x2e5   : > { %1275 = vmatmul.mubr.msk.f32.gmra.mrb[20].mxu0 %vm957_vm4, %v1554_v17 }
 0x2e6   : > { %1279 = vmatmul.mubr.msk.f32.gmra.mrb[20].mxu1 %vm957_vm4, %v1556_v18 }
 0x3ac   : > { %v1036_v19 = vpop.f32.mrb[14].mxu0 }
 0x3ad   : > { %v1141_v20 = vpop.f32.mrb[14].mxu1  ;;  %v1038_v21 = vpop.f32.mrb[15].mxu0 }
 0x3ae   : > { %v1164_v22 = vmul.f32 %v1141_v20, %v1036_v19  ;;  %v1143_v23 = vpop.f32.mrb[15].mxu1 }
 0x3af   : > { %v1165_v41 = vmul.f32 %v1143_v23, %v1038_v21 }
 0x3b0   : > { %v1172_v24 = vmul.f32 %v1164_v22, %v1839_v33  ;;  %v1042_v25 = vpop.f32.mrb[16].mxu0 }
 0x3b1   : > { %v1173_v26 = vmul.f32 %v1165_v41, %v1807_v16  ;;  %v1147_v27 = vpop.f32.mrb[16].mxu1  ;;  %v1044_v28 = vpop.f32.mrb[17].mxu0 }
 0x3b2   : > { %1180 = vst [vmem:[%s1955_s22] sm:$0xff] %v1172_v24  ;;  %v1166_v29 = vmul.f32 %v1147_v27, %v1042_v25  ;;  %v1149_v30 = vpop.f32.mrb[17].mxu1 }
 0x3b3   : > { %1181 = vst [vmem:[%s1955_s22 + $0x8] sm:$0xff] %v1173_v26  ;;  %v1167_v31 = vmul.f32 %v1149_v30, %v1044_v28 }
 0x3b4   : > { %v1174_v32 = vmul.f32 %v1166_v29, %v1848_v35  ;;  %v1048_v40 = vpop.f32.mrb[18].mxu0 }
 0x3b5   : > { %v1175_v42 = vmul.f32 %v1167_v31, %v1842_v34  ;;  %v1153_v43 = vpop.f32.mrb[18].mxu1  ;;  %v1050_v33 = vpop.f32.mrb[19].mxu0 }
 0x3b6   : > { %1182 = vst [vmem:[%s1955_s22 + $0x10] sm:$0xff] %v1174_v32  ;;  %v1168_v44 = vmul.f32 %v1153_v43, %v1048_v40  ;;  %v1155_v16 = vpop.f32.mrb[19].mxu1 }
 0x3b7   : > { %1183 = vst [vmem:[%s1955_s22 + $0x18] sm:$0xff] %v1175_v42  ;;  %v1169_v45 = vmul.f32 %v1155_v16, %v1050_v33 }
 0x3b8   : > { %v1176_v46 = vmul.f32 %v1168_v44, %v1858_v37  ;;  %v1054_v47 = vpop.f32.mrb[20].mxu0 }
 0x3b9   : > { %v1177_v48 = vmul.f32 %v1169_v45, %v1852_v36  ;;  %v1159_v49 = vpop.f32.mrb[20].mxu1  ;;  %v1056_v35 = vpop.f32.mrb[21].mxu0 }
 0x3ba   : > { %1184 = vst [vmem:[%s1955_s22 + $0x20] sm:$0xff] %v1176_v46  ;;  %v1170_v50 = vmul.f32 %v1159_v49, %v1054_v47  ;;  %v1161_v34 = vpop.f32.mrb[21].mxu1 }
 0x3bb   : > { %1185 = vst [vmem:[%s1955_s22 + $0x28] sm:$0xff] %v1177_v48  ;;  %v1171_v51 = vmul.f32 %v1161_v34, %v1056_v35 }
 0x3bc   : > { %v1178_v52 = vmul.f32 %v1170_v50, %v1868_v39 }
 0x3bd   : > { %v1179_v53 = vmul.f32 %v1171_v51, %v1862_v38 }
 0x3be   : > { %1186 = vst [vmem:[%s1955_s22 + $0x30] sm:$0xff] %v1178_v52 }
 0x3bf   : > { %1187 = vst [vmem:[%s1955_s22 + $0x38] sm:$0xff] %v1179_v53 }
 0x3c0 PF: > { %s18_s27 = sadd.s32 1, %s1563_s27  }
 0x3c1   : > { %p15_p4 = scmp.ge.s32.totalorder %s18_s27, 4  }
 0x3c3   :  { %17 = sbr.rel (!%p15_p4) target bundleno = 1 (0x1), region = 82 }

</bundles_post_ra>
